<compile_context>
chip_gen: v7x
topology: tpu7x:2x2x1
jax: 0.10.0
libtpu: 0.0.40
codegen_flags: <defaults>
</compile_context>

<pallas_src>
import functools

import jax
import jax.numpy as jnp
from jax.experimental import pallas as pl
from jax.experimental.pallas import tpu as pltpu


def _cdiv(a, b):
    return -(-a // b)


def _fast_recip(y):
    """1/y via EUP approximate reciprocal + one Newton-Raphson refinement."""
    r = pl.reciprocal(y, approx=True)
    return r * (2.0 - y * r)


def _layernorm_rows_kernel(x_ref, scale_ref, shift_ref, o_ref, *, eps, d):
    """General path: one logical row per physical row, reduce over lanes."""
    x = x_ref[...].astype(jnp.float32)                           # (tm, D)
    inv_d = 1.0 / float(d)
    mean = jnp.sum(x, axis=-1, keepdims=True) * inv_d            # (tm, 1)
    centered = x - mean
    var = jnp.sum(centered * centered, axis=-1, keepdims=True) * inv_d
    # NOTE: module adds eps to std (not inside the sqrt).
    inv = _fast_recip(jnp.sqrt(var) + eps)                       # (tm, 1)
    out = (scale_ref[...].astype(jnp.float32) * (centered * inv)
           + shift_ref[...].astype(jnp.float32))
    o_ref[...] = out.astype(o_ref.dtype)


def _layernorm_packed_kernel(x_ref, scale_ref, shift_ref, seg_ref, o_ref, *, eps, d):
    """Lane-dense path: g = 128//d logical rows packed into each 128-lane row.

    seg_ref is the (128, 128) block-diagonal segment-sum matrix; x @ seg gives
    every lane the sum over its own d-wide segment (its logical row) broadcast
    back across that segment -- computed on the otherwise idle MXU.  All ops
    are row/segment-local, so masked partial row-blocks stay self-contained.
    """
    x = x_ref[...].astype(jnp.float32)                           # (tm, 128)
    seg = seg_ref[...]                                           # (128, 128) f32
    inv_d = 1.0 / float(d)
    mean = jnp.dot(x, seg, preferred_element_type=jnp.float32) * inv_d
    centered = x - mean
    var = jnp.dot(centered * centered, seg,
                  preferred_element_type=jnp.float32) * inv_d
    inv = _fast_recip(jnp.sqrt(var) + eps)                       # (tm, 128)
    out = (scale_ref[...].astype(jnp.float32) * (centered * inv)
           + shift_ref[...].astype(jnp.float32))
    o_ref[...] = out.astype(o_ref.dtype)


def _vmem_params():
    """(working-set budget, vmem_limit_bytes) sized to the chip generation."""
    try:
        cap = int(getattr(pltpu.get_tpu_info(), "vmem_capacity_bytes", 128 << 20))
    except Exception:  # info unavailable at trace time -> conservative default
        cap = 128 << 20
    if cap <= (64 << 20):
        # v7x-class: 64 MiB physical VMEM per TensorCore.
        return 20 << 20, 40 << 20
    # v5e / v6e: 128 MiB physical VMEM. (A smaller budget, e.g. 16 MiB, also
    # reaches the HBM roofline on v5e if VMEM headroom is needed elsewhere.)
    return 32 << 20, 64 << 20


def _choose_row_tile(n_rows, d, itemsize, vmem_budget_bytes, *, min_steps=4):
    """Largest row tile that fits the budget while keeping a multi-step grid."""
    align = 8 if itemsize >= 4 else 16
    # Per grid step: double-buffered input + output tiles (4 * itemsize B/elem)
    # plus ~3 live f32 temporaries in the body (x, centered, pre-cast out).
    bytes_per_row = d * (4 * itemsize + 12)
    tm = vmem_budget_bytes // max(bytes_per_row, 1)
    tm = max(align, min(1024, (tm // align) * align))
    # Keep >= min_steps grid steps when possible so pipelining has work to
    # overlap and v7x's two TensorCores both receive "parallel" steps.
    tm = min(tm, max(align, _cdiv(_cdiv(n_rows, min_steps), align) * align))
    if tm >= n_rows:
        tm = n_rows   # single full-extent block (always a legal block shape)
    return int(tm)


def layer_norm(x, scale, shift, eps=1e-5, *, row_tile=None):
    """x: (..., D); scale/shift: (D,). Returns same shape/dtype as x."""
    orig_shape = x.shape
    D = orig_shape[-1]
    x2 = x.reshape(-1, D)
    N = x2.shape[0]
    itemsize = jnp.dtype(x.dtype).itemsize
    vmem_budget, vmem_limit = _vmem_params()
    compiler_params = pltpu.CompilerParams(
        dimension_semantics=("parallel",),
        vmem_limit_bytes=vmem_limit,
    )

    if D <= 64 and 128 % D == 0:
        # ---- Lane-dense path: pack g logical rows per 128-lane physical row
        # so output stores are full-lane (unmasked) and lanes are 100% used.
        g = 128 // D
        pad = (-N) % g
        if pad:  # zero rows, segment-local, sliced off below (no NaN risk)
            x2 = jnp.pad(x2, ((0, pad), (0, 0)))
        Np = x2.shape[0] // g
        xp = x2.reshape(Np, 128)
        scale_p = jnp.tile(scale.reshape(1, D), (1, g))
        shift_p = jnp.tile(shift.reshape(1, D), (1, g))
        seg_id = jnp.arange(128, dtype=jnp.int32) // D
        seg = (seg_id[:, None] == seg_id[None, :]).astype(jnp.float32)

        tm = row_tile if row_tile is not None else _choose_row_tile(
            Np, 128, itemsize, vmem_budget)
        kernel = functools.partial(_layernorm_packed_kernel, eps=eps, d=D)
        out_p = pl.pallas_call(
            kernel,
            out_shape=jax.ShapeDtypeStruct((Np, 128), x.dtype),
            grid_spec=pltpu.PrefetchScalarGridSpec(
                num_scalar_prefetch=0,
                grid=(_cdiv(Np, tm),),
                in_specs=[
                    pl.BlockSpec((tm, 128), lambda i: (i, 0)),
                    pl.BlockSpec((1, 128), lambda i: (0, 0)),
                    pl.BlockSpec((1, 128), lambda i: (0, 0)),
                    pl.BlockSpec((128, 128), lambda i: (0, 0)),
                ],
                out_specs=pl.BlockSpec((tm, 128), lambda i: (i, 0)),
            ),
            compiler_params=compiler_params,
        )(xp, scale_p, shift_p, seg)
        out2 = out_p.reshape(-1, D)
        if pad:
            out2 = out2[:N]
        return out2.reshape(orig_shape)

    # ---- General path: one logical row per physical row.
    # TODO(synk): small D that does not divide 128 (e.g. D=48) still
    # under-utilizes lanes here; a strided repack would be needed to fix it.
    tm = row_tile if row_tile is not None else _choose_row_tile(
        N, D, itemsize, vmem_budget)
    kernel = functools.partial(_layernorm_rows_kernel, eps=eps, d=D)
    out = pl.pallas_call(
        kernel,
        out_shape=jax.ShapeDtypeStruct((N, D), x.dtype),
        grid_spec=pltpu.PrefetchScalarGridSpec(
            num_scalar_prefetch=0,
            grid=(_cdiv(N, tm),),
            in_specs=[
                pl.BlockSpec((tm, D), lambda i: (i, 0)),
                pl.BlockSpec((1, D), lambda i: (0, 0)),
                pl.BlockSpec((1, D), lambda i: (0, 0)),
            ],
            out_specs=pl.BlockSpec((tm, D), lambda i: (i, 0)),
        ),
        compiler_params=compiler_params,
    )(x2, scale.reshape(1, D), shift.reshape(1, D))
    return out.reshape(orig_shape)


def _reference(x, scale, shift, eps=1e-5):
    mean = jnp.mean(x, axis=-1, keepdims=True)
    std = jnp.sqrt(jnp.mean((x - mean) ** 2, axis=-1, keepdims=True))
    normalized = (x - mean) / (std + eps)
    return scale * normalized + shift


if __name__ == "__main__":
    key = jax.random.PRNGKey(0)
    # Tolerance is set loosely enough to cover the EUP approximate-reciprocal
    # (+1 Newton step) path; real algorithmic bugs are orders of magnitude off.
    TOL = dict(atol=5e-4, rtol=5e-4)

    # Primary check: module-sized input (batch=2, seq=8, embed_dim=32)
    # -> lane-dense packed path (g = 4 rows per 128-lane row).
    batch, seq, embed_dim = 2, 8, 32
    scale = jnp.ones((embed_dim,), dtype=jnp.float32)    # nn.Parameter(torch.ones)
    shift = jnp.zeros((embed_dim,), dtype=jnp.float32)   # nn.Parameter(torch.zeros)
    x = jax.random.normal(key, (batch, seq, embed_dim), dtype=jnp.float32)

    out = jax.block_until_ready(layer_norm(x, scale, shift, eps=1e-5))
    ref = _reference(x, scale, shift, eps=1e-5)
    assert out.shape == x.shape and out.dtype == x.dtype
    assert jnp.allclose(out, ref, **TOL), "mismatch vs reference (packed path)"

    # Secondary check: D=128 general path with a masked partial row block
    # (N = 15 rows, tile = 8).
    k2 = jax.random.PRNGKey(0)
    D2 = 128
    x2 = jax.random.normal(k2, (3, 5, D2), dtype=jnp.float32)
    scale2 = jnp.ones((D2,), dtype=jnp.float32)
    shift2 = jnp.zeros((D2,), dtype=jnp.float32)
    out2 = jax.block_until_ready(layer_norm(x2, scale2, shift2, row_tile=8))
    ref2 = _reference(x2, scale2, shift2)
    assert jnp.allclose(out2, ref2, **TOL), "mismatch on general / partial-block path"

    # Third check: packed path where N is not a multiple of g (pad + repack).
    k3 = jax.random.PRNGKey(0)
    D3 = 32
    x3 = jax.random.normal(k3, (3, 3, D3), dtype=jnp.float32)   # N = 9, g = 4
    s3 = jnp.ones((D3,), dtype=jnp.float32)
    b3 = jnp.zeros((D3,), dtype=jnp.float32)
    out3 = jax.block_until_ready(layer_norm(x3, s3, b3))
    ref3 = _reference(x3, s3, b3)
    assert jnp.allclose(out3, ref3, **TOL), "mismatch on packed path with padding"

    print("KERNEL_OK")
</pallas_src>

<mosaic_0001>
module attributes {stable_mosaic.version = 11 : i64} {
  func.func @_layernorm_packed_kernel(%arg0: i32, %arg1: memref<4x128xf32, #tpu.memory_space<vmem>>, %arg2: memref<1x128xf32, #tpu.memory_space<vmem>>, %arg3: memref<1x128xf32, #tpu.memory_space<vmem>>, %arg4: memref<128x128xf32, #tpu.memory_space<vmem>>, %arg5: memref<4x128xf32, #tpu.memory_space<vmem>>) attributes {dimension_semantics = [#tpu.dimension_semantics<parallel>], iteration_bounds = array<i64: 1>, scalar_prefetch = 0 : i64, scratch_operands = 0 : i64, tpu.core_type = #tpu.core_type<tc>, window_params = [{transform_indices = @transform_0, window_bounds = array<i64: 4, 128>}, {pipeline_mode = #tpu.pipeline_mode<synchronous>, transform_indices = @transform_1, window_bounds = array<i64: 1, 128>}, {pipeline_mode = #tpu.pipeline_mode<synchronous>, transform_indices = @transform_2, window_bounds = array<i64: 1, 128>}, {pipeline_mode = #tpu.pipeline_mode<synchronous>, transform_indices = @transform_3, window_bounds = array<i64: 128, 128>}, {transform_indices = @transform_4, window_bounds = array<i64: 4, 128>}]} {
    %c0 = arith.constant 0 : index
    %c0_0 = arith.constant 0 : index
    %0 = vector.load %arg1[%c0, %c0_0] : memref<4x128xf32, #tpu.memory_space<vmem>>, vector<4x128xf32>
    %c0_1 = arith.constant 0 : index
    %c0_2 = arith.constant 0 : index
    %1 = vector.load %arg4[%c0_1, %c0_2] : memref<128x128xf32, #tpu.memory_space<vmem>>, vector<128x128xf32>
    %cst = arith.constant dense<0.000000e+00> : vector<4x128xf32>
    %2 = tpu.matmul %0, %1, %cst {dimension_numbers = #tpu.dot_dimension_numbers<[1], [0], [0], [1], [0, 0, 1, 1], [], []>} : vector<4x128xf32>, vector<128x128xf32>, vector<4x128xf32> -> vector<4x128xf32>
    %cst_3 = arith.constant 3.125000e-02 : f32
    %3 = vector.broadcast %cst_3 : f32 to vector<4x128xf32>
    %4 = arith.mulf %2, %3 : vector<4x128xf32>
    %5 = arith.subf %0, %4 : vector<4x128xf32>
    %6 = arith.mulf %5, %5 : vector<4x128xf32>
    %cst_4 = arith.constant dense<0.000000e+00> : vector<4x128xf32>
    %7 = tpu.matmul %6, %1, %cst_4 {dimension_numbers = #tpu.dot_dimension_numbers<[1], [0], [0], [1], [0, 0, 1, 1], [], []>} : vector<4x128xf32>, vector<128x128xf32>, vector<4x128xf32> -> vector<4x128xf32>
    %cst_5 = arith.constant 3.125000e-02 : f32
    %8 = vector.broadcast %cst_5 : f32 to vector<4x128xf32>
    %9 = arith.mulf %7, %8 : vector<4x128xf32>
    %10 = math.sqrt %9 : vector<4x128xf32>
    %cst_6 = arith.constant 9.99999974E-6 : f32
    %11 = vector.broadcast %cst_6 : f32 to vector<4x128xf32>
    %12 = arith.addf %10, %11 : vector<4x128xf32>
    %13 = tpu.reciprocal %12 {approx = true} : vector<4x128xf32> -> vector<4x128xf32>
    %14 = arith.mulf %12, %13 : vector<4x128xf32>
    %cst_7 = arith.constant 2.000000e+00 : f32
    %15 = vector.broadcast %cst_7 : f32 to vector<4x128xf32>
    %16 = arith.subf %15, %14 : vector<4x128xf32>
    %17 = arith.mulf %13, %16 : vector<4x128xf32>
    %c0_8 = arith.constant 0 : index
    %c0_9 = arith.constant 0 : index
    %18 = vector.load %arg2[%c0_8, %c0_9] : memref<1x128xf32, #tpu.memory_space<vmem>>, vector<1x128xf32>
    %19 = arith.mulf %5, %17 : vector<4x128xf32>
    %20 = vector.broadcast %18 : vector<1x128xf32> to vector<4x128xf32>
    %21 = arith.mulf %20, %19 : vector<4x128xf32>
    %c0_10 = arith.constant 0 : index
    %c0_11 = arith.constant 0 : index
    %22 = vector.load %arg3[%c0_10, %c0_11] : memref<1x128xf32, #tpu.memory_space<vmem>>, vector<1x128xf32>
    %23 = vector.broadcast %22 : vector<1x128xf32> to vector<4x128xf32>
    %24 = arith.addf %21, %23 : vector<4x128xf32>
    %c0_12 = arith.constant 0 : index
    %c0_13 = arith.constant 0 : index
    %25 = vector.load %arg5[%c0_12, %c0_13] : memref<4x128xf32, #tpu.memory_space<vmem>>, vector<4x128xf32>
    tpu.vector_store %arg5[%c0_12, %c0_13], %24 {strides = array<i32>} : memref<4x128xf32, #tpu.memory_space<vmem>>, vector<4x128xf32>,
    return
  }
  func.func @transform_0(%arg0: i32) -> (i32, i32) {
    %c0_i32 = arith.constant 0 : i32
    %c0_i32_0 = arith.constant 0 : i32
    return %arg0, %c0_i32 : i32, i32
  }
  func.func @transform_1(%arg0: i32) -> (i32, i32) {
    %c0_i32 = arith.constant 0 : i32
    %c0_i32_0 = arith.constant 0 : i32
    %c0_i32_1 = arith.constant 0 : i32
    return %c0_i32, %c0_i32_0 : i32, i32
  }
  func.func @transform_2(%arg0: i32) -> (i32, i32) {
    %c0_i32 = arith.constant 0 : i32
    %c0_i32_0 = arith.constant 0 : i32
    %c0_i32_1 = arith.constant 0 : i32
    return %c0_i32, %c0_i32_0 : i32, i32
  }
  func.func @transform_3(%arg0: i32) -> (i32, i32) {
    %c0_i32 = arith.constant 0 : i32
    %c0_i32_0 = arith.constant 0 : i32
    %c0_i32_1 = arith.constant 0 : i32
    return %c0_i32, %c0_i32_0 : i32, i32
  }
  func.func @transform_4(%arg0: i32) -> (i32, i32) {
    %c0_i32 = arith.constant 0 : i32
    %c0_i32_0 = arith.constant 0 : i32
    return %arg0, %c0_i32 : i32, i32
  }
}

</mosaic_0001>

<bundles_post_ra>
// kernel: tpu_custom_call.1
= control target key start
LH: loop header
LB: loop body
LE: loop exit
PB: predicated region body
PF: predicated region fallthrough
CT: control target
= control target key end

     0   :  { %9 = vsyncpa [#allocation3], 0  ;;  %s663_s0 = inlined_call_operand.hbm [shape: f32[4,128], index: 0, kind: input, shape index: {}]   ;;  %s664_s1 = inlined_call_operand.hbm [shape: f32[1,128], index: 1, kind: input, shape index: {}]   ;;  %s665_s2 = inlined_call_operand.hbm [shape: f32[1,128], index: 2, kind: input, shape index: {}]   ;;  %s666_s3 = inlined_call_operand.hbm [shape: f32[128,128], index: 3, kind: input, shape index: {}]   ;;  %s667_s4 = inlined_call_operand.hbm [shape: f32[4,128], index: 4, kind: output, shape index: {}]  }
   0x1   :  { %10 = vsyncpa [#allocation6], 0 }
   0x2   :  { %11 = vsyncpa [#allocation9], 0 }
   0x3   :  { %12 = vsyncpa [#allocation4], 0  ;;  %s561_s15 = smov [#allocation5]   ;;  %s562_s17 = smov [#allocation2]  }
   0x4   :  { %s29_s16 = sshll.u32 %s561_s15, 4  ;;  %s19_s18 = sshll.u32 %s562_s17, 4  ;;  %s30_s16 = int_to_ptr.vmem [resolvable:$true] %s29_s16  ;;  %s20_s18 = int_to_ptr.vmem [resolvable:$true] %s19_s18 }
   0x5   :  { %s443_s21 = scalar_lea.hbm %s664_s1, 16 }
   0x6   :  { %p444_p0 = scmp.ne.s32.totalorder %s664_s1, %s443_s21  ;;  %p447_p1 = scmp.lt.u32.totalorder %s443_s21, %s664_s1 }
   0x8   :  { %p449_p2 = pnand %p447_p1, %p444_p0 }
   0xa   :  { %452 = shalt.err (!%p449_p2)
}
   0xb   :  { %s453_s26 = scalar_lea.vmem %s30_s16, 16  ;;  %s457_s27 = scalar_lea.vmem %s30_s16, 32 }
   0xc   :  { %p454_p3 = scmp.ne.s32.totalorder %s30_s16, %s453_s26  ;;  %p458_p4 = scmp.lt.s32.totalorder %s30_s16, %s30_s16 }
   0xd   :  { %p459_p5 = scmp.lt.s32.totalorder %s457_s27, %s453_s26 }
   0xf   :  { %p460_p6 = por %p459_p5, %p458_p4 }
  0x11   :  { %p461_p7 = pnand %p460_p6, %p454_p3 }
  0x13   :  { %464 = shalt.err (!%p461_p7)
}
  0x14   :  { %32 = dma.hbm_to_vmem [thread:$0]  %s664_s1, 16, %s30_s16, [#allocation6]  }
  0x15   :  { %s465_s6 = scalar_lea.hbm %s663_s0, 64 }
  0x16   :  { %p466_p8 = scmp.ne.s32.totalorder %s663_s0, %s465_s6  ;;  %p469_p9 = scmp.lt.u32.totalorder %s465_s6, %s663_s0 }
  0x18   :  { %p471_p10 = pnand %p469_p9, %p466_p8 }
  0x1a   :  { %474 = shalt.err (!%p471_p10)
}
  0x1b   :  { %s475_s11 = scalar_lea.vmem %s20_s18, 64  ;;  %p480_p12 = scmp.lt.s32.totalorder %s20_s18, %s20_s18 }
  0x1c   :  { %p476_p11 = scmp.ne.s32.totalorder %s20_s18, %s475_s11  ;;  %p481_p13 = scmp.lt.s32.totalorder %s475_s11, %s475_s11 }
  0x1e   :  { %p482_p0 = por %p481_p13, %p480_p12 }
  0x20   :  { %p483_p1 = pnand %p482_p0, %p476_p11 }
  0x22   :  { %486 = shalt.err (!%p483_p1)
}
  0x23   :  { %22 = dma.hbm_to_vmem [thread:$0]  %s663_s0, 64, %s20_s18, [#allocation3]  }
  0x24   :  { %s563_s13 = smov [#allocation7]   ;;  %s564_s15 = smov [#allocation8]  }
  0x25   :  { %s39_s14 = sshll.u32 %s563_s13, 4  ;;  %s48_s16 = sshll.u32 %s564_s15, 4  ;;  %s40_s14 = int_to_ptr.vmem [resolvable:$true] %s39_s14  ;;  %s620_s16 = int_to_ptr.vmem [resolvable:$true] %s48_s16 }
  0x26   :  { %s487_s20 = scalar_lea.hbm %s665_s2, 16 }
  0x27   :  { %p488_p2 = scmp.ne.s32.totalorder %s665_s2, %s487_s20  ;;  %p491_p3 = scmp.lt.u32.totalorder %s487_s20, %s665_s2 }
  0x29   :  { %p493_p4 = pnand %p491_p3, %p488_p2 }
  0x2b   :  { %496 = shalt.err (!%p493_p4)
}
  0x2c   :  { %s497_s0 = scalar_lea.vmem %s40_s14, 16  ;;  %s501_s18 = scalar_lea.vmem %s40_s14, 32 }
  0x2d   :  { %p498_p5 = scmp.ne.s32.totalorder %s40_s14, %s497_s0  ;;  %p502_p6 = scmp.lt.s32.totalorder %s40_s14, %s40_s14 }
  0x2e   :  { %p503_p7 = scmp.lt.s32.totalorder %s501_s18, %s497_s0 }
  0x30   :  { %p504_p8 = por %p503_p7, %p502_p6 }
  0x32   :  { %p505_p9 = pnand %p504_p8, %p498_p5 }
  0x34   :  { %508 = shalt.err (!%p505_p9)
}
  0x35   :  { %42 = dma.hbm_to_vmem [thread:$0]  %s665_s2, 16, %s40_s14, [#allocation6]  }
  0x36   :  { %s509_s29 = scalar_lea.hbm %s666_s3, 2048 }
  0x37   :  { %p510_p10 = scmp.ne.s32.totalorder %s666_s3, %s509_s29  ;;  %p513_p11 = scmp.lt.u32.totalorder %s509_s29, %s666_s3 }
  0x39   :  { %p515_p12 = pnand %p513_p11, %p510_p10 }
  0x3b   :  { %518 = shalt.err (!%p515_p12)
}
  0x3c   :  { %s519_s8 = scalar_lea.vmem %s620_s16, 2048  ;;  %p524_p0 = scmp.lt.s32.totalorder %s620_s16, %s620_s16 }
  0x3d   :  { %p520_p13 = scmp.ne.s32.totalorder %s620_s16, %s519_s8  ;;  %p525_p1 = scmp.lt.s32.totalorder %s519_s8, %s519_s8 }
  0x3f   :  { %p526_p2 = por %p525_p1, %p524_p0 }
  0x41   :  { %p527_p3 = pnand %p526_p2, %p520_p13 }
  0x43   :  { %530 = shalt.err (!%p527_p3)
}
  0x44   :  { %s565_s2 = smov 128   ;;  %s566_s9 = smov 8  }
  0x45   :  { %54 = dma.hbm_to_vmem [thread:$0]  %s666_s3, 2048, %s620_s16, [#allocation9], %s565_s2, %s565_s2, %s566_s9  }
  0x46   :  { %553 = dma.done.wait [#allocation3], 64  }
  0x47   :  { %554 = vsyncadd [#allocation3], 4294967232 }
  0x48   :  { %555 = dma.done.wait [#allocation6], 32  }
  0x49   :  { %556 = vsyncadd [#allocation6], 4294967264 }
  0x4a   :  { %557 = dma.done.wait [#allocation9], 2048  }
  0x4b   :  { %558 = vsyncadd [#allocation9], 4294965248  ;;  %v567_v0 = vmov 0.0|0.0   ;;  %vm568_vm0 = vmmov 0   ;;  %v569_v1 = vmov 0.0   ;;  %v68_v2 = vld [vmem:[#allocation8] sm:$0xff] }
  0x4c   :  { %381 = vmatprep.subr.bf16.mxu0 %v567_v0  ;;  %343 = vmatprep.mubr.msk.f32.mxu0 %vm568_vm0, %v569_v1  ;;  %v69_v3 = vld [vmem:[#allocation8 + $0x8] sm:$0xff]  ;;  %v70_v4 = vld [vmem:[#allocation8 + $0x10] sm:$0xff]  ;;  %v71_v6 = vld [vmem:[#allocation8 + $0x18] sm:$0xff]  ;;  %s570_s3 = smov [#allocation10]  }
  0x4d   :  { %405 = vmatprep.subr.bf16.mxu1 %v567_v0  ;;  %378 = vmatprep.mubr.msk.f32.mxu1 %vm568_vm0, %v569_v1  ;;  %v382_v5 = vpack.c.bf16 %v69_v3, %v68_v2  ;;  %v385_v7 = vpack.c.bf16 %v71_v6, %v70_v4  ;;  %v72_v8 = vld [vmem:[#allocation8 + $0x20] sm:$0xff]  ;;  %v73_v9 = vld [vmem:[#allocation8 + $0x28] sm:$0xff]  ;;  %v74_v11 = vld [vmem:[#allocation8 + $0x30] sm:$0xff]  ;;  %s264_s1 = sshll.u32 %s570_s3, 4  ;;  %s265_s1 = int_to_ptr.vmem [resolvable:$true] %s264_s1 }
  0x4e   :  { %v388_v10 = vpack.c.bf16 %v73_v9, %v72_v8  ;;  %v75_v12 = vld [vmem:[#allocation8 + $0x38] sm:$0xff]  ;;  %v76_v14 = vld [vmem:[#allocation8 + $0x40] sm:$0xff]  ;;  %v77_v15 = vld [vmem:[#allocation8 + $0x48] sm:$0xff]  ;;  %s531_s12 = scalar_lea.vmem %s265_s1, 64  ;;  %p536_p5 = scmp.lt.s32.totalorder %s265_s1, %s265_s1 }
  0x4f   :  { %383 = vmatpush3.bf16.msra.mxu0 %v382_v5  ;;  %407 = vmatpush3.bf16.msra.mxu1 %v382_v5  ;;  %v391_v13 = vpack.c.bf16 %v75_v12, %v74_v11  ;;  %v394_v16 = vpack.c.bf16 %v77_v15, %v76_v14  ;;  %v78_v17 = vld [vmem:[#allocation8 + $0x50] sm:$0xff]  ;;  %v79_v18 = vld [vmem:[#allocation8 + $0x58] sm:$0xff]  ;;  %v80_v20 = vld [vmem:[#allocation8 + $0x60] sm:$0xff]  ;;  %p532_p4 = scmp.ne.s32.totalorder %s265_s1, %s531_s12  ;;  %p537_p6 = scmp.lt.s32.totalorder %s531_s12, %s531_s12 }
  0x50   :  { %384 = vmatprep.subr.bf16.mxu0 %v567_v0  ;;  %408 = vmatprep.subr.bf16.mxu1 %v567_v0  ;;  %v397_v19 = vpack.c.bf16 %v79_v18, %v78_v17  ;;  %v81_v21 = vld [vmem:[#allocation8 + $0x68] sm:$0xff]  ;;  %v82_v23 = vld [vmem:[#allocation8 + $0x70] sm:$0xff]  ;;  %v83_v24 = vld [vmem:[#allocation8 + $0x78] sm:$0xff] }
  0x51   :  { %v400_v22 = vpack.c.bf16 %v81_v21, %v80_v20  ;;  %v403_v25 = vpack.c.bf16 %v83_v24, %v82_v23  ;;  %v67_v26 = vld [vmem:[#allocation2] sm:$0xf]  ;;  %v275_v45 = vld [vmem:[#allocation5] ss:$0 sm:$0xff]  ;;  %v276_v47 = vld [vmem:[#allocation7] ss:$0 sm:$0xff]  ;;  %p538_p7 = por %p537_p6, %p536_p5 }
  0x53   :  { %386 = vmatpush3.bf16.msra.mxu0 %v385_v7  ;;  %410 = vmatpush3.bf16.msra.mxu1 %v385_v7  ;;  %p539_p8 = pnand %p538_p7, %p532_p4 }
  0x54   :  { %387 = vmatprep.subr.bf16.mxu0 %v567_v0  ;;  %411 = vmatprep.subr.bf16.mxu1 %v567_v0 }
  0x57   :  { %389 = vmatpush3.bf16.msra.mxu0 %v388_v10  ;;  %413 = vmatpush3.bf16.msra.mxu1 %v388_v10 }
  0x58   :  { %390 = vmatprep.subr.bf16.mxu0 %v567_v0  ;;  %414 = vmatprep.subr.bf16.mxu1 %v567_v0 }
  0x5b   :  { %392 = vmatpush3.bf16.msra.mxu0 %v391_v13  ;;  %416 = vmatpush3.bf16.msra.mxu1 %v391_v13 }
  0x5c   :  { %393 = vmatprep.subr.bf16.mxu0 %v567_v0  ;;  %417 = vmatprep.subr.bf16.mxu1 %v567_v0 }
  0x5f   :  { %395 = vmatpush3.bf16.msra.mxu0 %v394_v16  ;;  %419 = vmatpush3.bf16.msra.mxu1 %v394_v16 }
  0x60   :  { %396 = vmatprep.subr.bf16.mxu0 %v567_v0  ;;  %420 = vmatprep.subr.bf16.mxu1 %v567_v0 }
  0x63   :  { %398 = vmatpush3.bf16.msra.mxu0 %v397_v19  ;;  %422 = vmatpush3.bf16.msra.mxu1 %v397_v19 }
  0x64   :  { %399 = vmatprep.subr.bf16.mxu0 %v567_v0  ;;  %423 = vmatprep.subr.bf16.mxu1 %v567_v0 }
  0x67   :  { %401 = vmatpush3.bf16.msra.mxu0 %v400_v22  ;;  %425 = vmatpush3.bf16.msra.mxu1 %v400_v22 }
  0x68   :  { %402 = vmatprep.subr.bf16.mxu0 %v567_v0  ;;  %426 = vmatprep.subr.bf16.mxu1 %v567_v0 }
  0x6b   :  { %404 = vmatpush3.bf16.msra.mxu0 %v403_v25  ;;  %428 = vmatpush3.bf16.msra.mxu1 %v403_v25 }
  0x6e   :  { %344 = vmatmul.mubr.f32.vlgmr.msra.gmra.mrb[0].mxu0 %v67_v26 }
 0x141   :  { %v150_v27 = vpop.f32.mrb[0].mxu0 }
 0x142   :  { %v154_v28 = vmul.f32 0.03125, %v150_v27  ;;  %v345_v29 = vpop.f32.mrb[1].mxu0 }
 0x144   :  { %v155_v30 = vsub.f32 %v67_v26, %v154_v28 }
 0x146   :  { %v156_v31 = vmul.f32 %v155_v30, %v155_v30 }
 0x148   :  { %379 = vmatmul.mubr.f32.vlgmr.msra.gmra.mrb[0].mxu1 %v156_v31 }
 0x21b   :  { %v223_v32 = vpop.f32.mrb[0].mxu1 }
 0x21c   :  { %v227_v33 = vmul.f32 0.03125, %v223_v32  ;;  %v380_v34 = vpop.f32.mrb[1].mxu1 }
 0x21e   :  { %439 = vrsqrt.f32 %v227_v33  ;;  %vm230_vm1 = vcmp.eq.f32.partialorder %v227_v33, inf  ;;  %v233_v37 = vand.u32 2147483648, %v227_v33  ;;  %vm232_vm2 = vcmp.eq.f32.partialorder %v227_v33, 0.0 }
 0x228   :  { %v440_v35 = vpop.eup %439 }
 0x229   :  { %v229_v36 = vmul.f32 %v440_v35, %v227_v33 }
 0x22b   :  { %v231_v38 = vsel %vm230_vm1, %v227_v33, %v229_v36 }
 0x22c   :  { %v234_v39 = vsel %vm232_vm2, %v233_v37, %v231_v38 }
 0x22d   :  { %v235_v40 = vadd.f32 1e-05, %v234_v39 }
 0x22f   :  { %441 = vrcp.f32 %v235_v40 }
 0x239   :  { %v442_v41 = vpop.eup %441 }
 0x23a   :  { %v237_v42 = vmul.f32 %v442_v41, %v235_v40 }
 0x23c   :  { %v238_v43 = vsub.f32 2.0, %v237_v42 }
 0x23e   :  { %v239_v44 = vmul.f32 %v442_v41, %v238_v43 }
 0x240   :  { %v241_v46 = vmul.f32 %v239_v44, %v155_v30 }
 0x242   :  { %v248_v48 = vmul.f32 %v275_v45, %v241_v46 }
 0x244   :  { %v256_v49 = vadd.f32 %v276_v47, %v248_v48 }
 0x246   :  { %257 = vst [vmem:[#allocation10] sm:$0xf] %v256_v49 }
 0x247   :  { %542 = shalt.err (!%p539_p8)
}
 0x248   :  { %s543_s15 = scalar_lea.hbm %s667_s4, 64 }
 0x249   :  { %p544_p9 = scmp.ne.s32.totalorder %s667_s4, %s543_s15  ;;  %p547_p10 = scmp.lt.u32.totalorder %s543_s15, %s667_s4 }
 0x24b   :  { %p549_p11 = pnand %p547_p10, %p544_p9 }
 0x24d   :  { %552 = shalt.err (!%p549_p11)
}
 0x24e   :  { %267 = dma.vmem_to_hbm [thread:$0]  %s265_s1, 64, %s667_s4, [#allocation4]  }
 0x24f   :  { %559 = dma.done.wait [#allocation4], 64  }
 0x250   :  { %560 = vsyncadd [#allocation4], 4294967232 }
 0x251   :  { %271 = vsyncpa [#allocation3], 1 }
 0x252   :  { %272 = vsyncpa [#allocation6], 1 }
 0x253   :  { %273 = vsyncpa [#allocation9], 1 }
 0x254   :  { %274 = vsyncpa [#allocation4], 1 }

</bundles_post_ra>
